<compile_context>
chip_gen: v5e
topology: v5e:2x2
jax: 0.10.0
libtpu: 0.0.40
codegen_flags: <defaults>
</compile_context>

<pallas_src>
import functools
from typing import NamedTuple, Tuple

import jax
import jax.numpy as jnp
from jax.experimental import pallas as pl
from jax.experimental.pallas import tpu as pltpu

_LANE = 128  # lane (last-dim) tiling quantum


def _round_up(x, m):
    return (x + m - 1) // m * m


def _sublane(dtype):
    # 8 rows for 4-byte dtypes, 16 for bf16/f16, 32 for 1-byte dtypes.
    return max(8, 32 // jnp.dtype(dtype).itemsize)


def _vmem_budgets():
    """Generation-aware (physical, scoped-limit, resident-weight) VMEM budgets."""
    cap = 64 * 1024 * 1024  # conservative default: v7x per-TensorCore VMEM
    try:
        info = pltpu.get_tpu_info()
        c = getattr(info, "vmem_capacity_bytes", None)
        if c:
            cap = int(c)
    except Exception:
        pass
    if cap <= 64 * 1024 * 1024:
        # v7x-class (64 MiB/TC): leave headroom for compiler internal scratch.
        limit = cap - 8 * 1024 * 1024            # ~56 MiB
        weight_budget = limit - 32 * 1024 * 1024  # ~24 MiB resident weights
    else:
        # v5e / v6e (128 MiB): raise well past the default scoped limit.
        limit = cap - 16 * 1024 * 1024            # ~112 MiB
        weight_budget = limit - 16 * 1024 * 1024  # ~96 MiB resident weights
    return cap, limit, max(weight_budget, 8 * 1024 * 1024)


class PreparedMLP(NamedTuple):
    """Lane-padded weight stack, built once and reused across forward calls."""
    weights: Tuple[jax.Array, ...]   # (Kp_i, Np_i), compute dtype
    biases: Tuple[jax.Array, ...]    # (1, Np_i), f32
    in_dim: int
    out_dim: int
    layer_dims: Tuple[Tuple[int, int], ...]


def prepare_mlp_params(params, compute_dtype=jnp.bfloat16):
    """Zero-pad every (w, b) to lane multiples ONCE (avoids per-call HBM traffic)."""
    weights, biases, dims = [], [], []
    in_dim = params[0][0].shape[0]
    out_dim = params[-1][0].shape[1]
    k_prev = _round_up(in_dim, _LANE)
    for (w, b) in params:
        k_i, n_i = w.shape
        kp, np_ = _round_up(k_i, _LANE), _round_up(n_i, _LANE)
        assert kp == k_prev, "layer dims must chain (out_i == in_{i+1})"
        w_p = jnp.zeros((kp, np_), compute_dtype).at[:k_i, :n_i].set(
            w.astype(compute_dtype))
        b_p = jnp.zeros((1, np_), jnp.float32).at[0, :n_i].set(
            b.astype(jnp.float32))
        weights.append(w_p)
        biases.append(b_p)
        dims.append((k_i, n_i))
        k_prev = np_
    return PreparedMLP(tuple(weights), tuple(biases), in_dim, out_dim, tuple(dims))


# --------------------------------------------------------------------------
# Fused (weights-resident) kernel: whole layer stack in one pallas_call.
# --------------------------------------------------------------------------
def _fused_mlp_kernel(x_ref, *refs, num_layers):
    """refs = (w0, b0, w1, b1, ..., w_{L-1}, b_{L-1}, o_ref)."""
    o_ref = refs[-1]
    compute_dtype = x_ref.dtype
    h = x_ref[...]                              # (tm, K0p)
    for l in range(num_layers):
        w = refs[2 * l][...]                    # (Kp, Np), VMEM-resident
        b = refs[2 * l + 1][...]                # (1, Np), f32
        y = jnp.dot(h, w, preferred_element_type=jnp.float32)
        y = y + b                               # f32 bias add
        if l < num_layers - 1:
            h = jnp.maximum(y, 0.0).astype(compute_dtype)
        else:
            o_ref[...] = y.astype(o_ref.dtype)


def _run_fused(x_p, prepared, out_dtype, M, tm, vmem_limit, single_buffer_weights):
    K0p = x_p.shape[1]
    Nlp = prepared.weights[-1].shape[1]
    num_layers = len(prepared.weights)

    # Constant index_map => resident; Buffered(1) drops the useless 2x buffer.
    wb_mode = {"pipeline_mode": pl.Buffered(1)} if single_buffer_weights else {}

    in_specs = [pl.BlockSpec((tm, K0p), lambda i: (i, 0))]
    flat_args = [x_p]
    for w_p, b_p in zip(prepared.weights, prepared.biases):
        in_specs.append(pl.BlockSpec(w_p.shape, lambda i: (0, 0), **wb_mode))
        in_specs.append(pl.BlockSpec(b_p.shape, lambda i: (0, 0), **wb_mode))
        flat_args.extend([w_p, b_p])

    grid_m = pl.cdiv(M, tm)
    flops = sum(2 * M * w.shape[0] * w.shape[1] for w in prepared.weights)
    resident_bytes = sum(w.size * w.dtype.itemsize + b.size * b.dtype.itemsize
                         for w, b in zip(prepared.weights, prepared.biases))
    bytes_acc = (x_p.size * x_p.dtype.itemsize + resident_bytes
                 + M * Nlp * jnp.dtype(out_dtype).itemsize)

    return pl.pallas_call(
        functools.partial(_fused_mlp_kernel, num_layers=num_layers),
        out_shape=jax.ShapeDtypeStruct((M, Nlp), out_dtype),
        grid=(grid_m,),
        in_specs=in_specs,
        out_specs=pl.BlockSpec((tm, Nlp), lambda i: (i, 0)),
        compiler_params=pltpu.CompilerParams(
            dimension_semantics=("parallel",),
            vmem_limit_bytes=int(vmem_limit)),
        cost_estimate=pl.CostEstimate(
            flops=int(flops), transcendentals=0, bytes_accessed=int(bytes_acc)),
    )(*flat_args)


# --------------------------------------------------------------------------
# Streamed per-layer fallback (weight stack too large to be VMEM-resident).
# --------------------------------------------------------------------------
def _linear_kernel(x_ref, w_ref, b_ref, o_ref, acc_ref, *, apply_relu):
    k = pl.program_id(2)

    @pl.when(k == 0)
    def _():
        acc_ref[...] = jnp.zeros_like(acc_ref)

    acc_ref[...] += jnp.dot(x_ref[...], w_ref[...],
                            preferred_element_type=jnp.float32)

    @pl.when(k == pl.num_programs(2) - 1)
    def _():
        y = acc_ref[...] + b_ref[...]
        if apply_relu:
            y = jnp.maximum(y, 0.0)
        o_ref[...] = y.astype(o_ref.dtype)


def _linear_layer(h, w_p, b_p, *, apply_relu, out_dtype, tm, vmem_limit):
    M, Kp = h.shape
    Np = w_p.shape[1]
    tn = 256 if Np % 256 == 0 else 128
    tk = 512 if Kp % 512 == 0 else (256 if Kp % 256 == 0 else 128)
    grid = (pl.cdiv(M, tm), Np // tn, Kp // tk)
    return pl.pallas_call(
        functools.partial(_linear_kernel, apply_relu=apply_relu),
        out_shape=jax.ShapeDtypeStruct((M, Np), out_dtype),
        grid=grid,
        in_specs=[pl.BlockSpec((tm, tk), lambda i, j, k: (i, k)),
                  pl.BlockSpec((tk, tn), lambda i, j, k: (k, j)),
                  pl.BlockSpec((1, tn), lambda i, j, k: (0, j))],
        out_specs=pl.BlockSpec((tm, tn), lambda i, j, k: (i, j)),
        scratch_shapes=[pltpu.VMEM((tm, tn), jnp.float32)],
        compiler_params=pltpu.CompilerParams(
            dimension_semantics=("parallel", "parallel", "arbitrary"),
            vmem_limit_bytes=int(vmem_limit)),
    )(h, w_p, b_p)


# --------------------------------------------------------------------------
# Wrapper
# --------------------------------------------------------------------------
def _choose_tm(M, sub, est_fn, budget):
    """Largest row tile whose accounted VMEM estimate fits the budget."""
    m_rounded = max(sub, _round_up(M, sub))
    cands = sorted({_round_up(min(c, m_rounded), sub)
                    for c in (m_rounded, 1024, 768, 512, 384, 256, 128,
                              64, 32, 16, 8)},
                   reverse=True)
    tm = cands[-1]
    for c in cands:
        if est_fn(c) <= budget:
            tm = c
            break
    # v7x has 2 TensorCores: avoid a 1-step grid when there is enough work
    # (prefer shrinking tm over leaving a core idle).
    if pl.cdiv(M, tm) == 1 and m_rounded >= 512:
        tm = _round_up(-(-m_rounded // 2), sub)
    return tm


def mlp_forward(x, params, *, compute_dtype=jnp.bfloat16, tm=None,
                force_streaming=False):
    """Pallas MLP forward. x: (..., input_dim) -> (..., output_dim).

    `params` is either a list of (w, b) with w:(in,out), b:(out,), or a
    `PreparedMLP` built once with `prepare_mlp_params` (preferred: avoids
    re-padding the weight stack through HBM on every call).
    """
    if isinstance(params, PreparedMLP):
        prepared = params
    else:
        prepared = prepare_mlp_params(params, compute_dtype)

    lead_shape = x.shape[:-1]
    in_dim = x.shape[-1]
    assert in_dim == prepared.in_dim
    out_dtype = x.dtype
    cdt = prepared.weights[0].dtype

    x2d = x.reshape(-1, in_dim).astype(cdt)
    M = x2d.shape[0]
    K0p = prepared.weights[0].shape[0]
    if K0p != in_dim:                      # feature-dim zero pad only (no M_pad copy)
        x2d = jnp.pad(x2d, ((0, 0), (0, K0p - in_dim)))
    Nlp = prepared.weights[-1].shape[1]

    sub = _sublane(cdt)
    act = jnp.dtype(cdt).itemsize
    outb = jnp.dtype(out_dtype).itemsize
    resident = sum(w.size * w.dtype.itemsize + b.size * b.dtype.itemsize
                   for w, b in zip(prepared.weights, prepared.biases))
    widest_k = max(w.shape[0] for w in prepared.weights)
    widest_n = max(w.shape[1] for w in prepared.weights)

    _, vmem_limit, weight_budget = _vmem_budgets()

    def est(t, w_bufs=1):
        # double-buffered x/out tiles + resident weights + live in-kernel set
        # (f32 matmul result of the widest layer, its activation operand, and
        #  the f32 last-layer result).
        live = t * widest_n * 4 + t * widest_k * act + t * Nlp * 4
        return int(1.15 * (2 * t * K0p * act + 2 * t * Nlp * outb
                           + w_bufs * resident + live))

    out = None
    use_fused = ((not force_streaming) and resident <= weight_budget
                 and est(sub) <= vmem_limit)
    if use_fused:
        if tm is None:
            t = _choose_tm(M, sub, est, vmem_limit)
        else:
            t = max(sub, _round_up(min(tm, _round_up(M, sub)), sub))
        try:
            out = jax.block_until_ready(
                _run_fused(x2d, prepared, out_dtype, M, t, vmem_limit, True))
        except Exception:
            try:  # retry with default (double-buffered) weight specs
                out = jax.block_until_ready(
                    _run_fused(x2d, prepared, out_dtype, M, t, vmem_limit, False))
            except Exception:
                out = None

    if out is None:
        # Streamed per-layer path: weights tiled over (K, N), f32 accumulator.
        t = min(_round_up(M, sub), _round_up(256, sub))
        h = x2d
        n_layers = len(prepared.weights)
        for i, (w_p, b_p) in enumerate(zip(prepared.weights, prepared.biases)):
            last = (i == n_layers - 1)
            h = _linear_layer(h, w_p, b_p, apply_relu=not last,
                              out_dtype=(out_dtype if last else cdt),
                              tm=t, vmem_limit=vmem_limit)
        out = h

    out = out[:, :prepared.out_dim].astype(out_dtype)
    return out.reshape(*lead_shape, prepared.out_dim)


# --------------------------------------------------------------------------
# Init / reference / test
# --------------------------------------------------------------------------
def init_mlp_params(key, input_dim, hidden_dim, output_dim, num_layers,
                    dtype=jnp.float32):
    """Mimics nn.Linear's U(-1/sqrt(fan_in), 1/sqrt(fan_in)).
    Weights stored as (in_features, out_features) so the kernel computes x @ W + b."""
    h = [hidden_dim] * (num_layers - 1)
    dims = list(zip([input_dim] + h, h + [output_dim]))
    params = []
    for (n_in, n_out) in dims:
        key, kw, kb = jax.random.split(key, 3)
        bound = 1.0 / (n_in ** 0.5)
        w = jax.random.uniform(kw, (n_in, n_out), dtype, -bound, bound)
        b = jax.random.uniform(kb, (n_out,), dtype, -bound, bound)
        params.append((w, b))
    return params


def mlp_reference(x, params):
    """Pure-JAX reference matching PyTorch semantics."""
    num_layers = len(params)
    for i, (w, b) in enumerate(params):
        x = x @ w + b
        if i < num_layers - 1:
            x = jax.nn.relu(x)
    return x


if __name__ == "__main__":
    batch, seq = 2, 8
    input_dim, hidden_dim, output_dim, num_layers = 16, 32, 8, 3

    key = jax.random.PRNGKey(0)
    kx, kp, kx2 = jax.random.split(key, 3)
    x = jax.random.normal(kx, (batch, seq, input_dim), jnp.float32)
    params = init_mlp_params(kp, input_dim, hidden_dim, output_dim, num_layers)
    ref = mlp_reference(x, params)

    # 1) Default path: bf16 MXU compute (f32 accumulation), cached padded params.
    prepared_bf16 = prepare_mlp_params(params, jnp.bfloat16)
    out = jax.block_until_ready(mlp_forward(x, prepared_bf16))
    assert out.shape == (batch, seq, output_dim)
    assert jnp.allclose(out, ref, atol=5e-2, rtol=5e-2), "bf16 path mismatch"

    # 2) f32 compute path (exact vs reference).
    prepared_f32 = prepare_mlp_params(params, jnp.float32)
    out32 = jax.block_until_ready(mlp_forward(x, prepared_f32))
    assert jnp.allclose(out32, ref, atol=1e-5, rtol=1e-5), "f32 path mismatch"

    # 3) Non-tile-aligned leading dims exercise the partial-block (cdiv) path.
    x2 = jax.random.normal(kx2, (3, 5, input_dim), jnp.float32)
    ref2 = mlp_reference(x2, params)
    out2 = jax.block_until_ready(mlp_forward(x2, prepared_f32))
    assert out2.shape == (3, 5, output_dim)
    assert jnp.allclose(out2, ref2, atol=1e-5, rtol=1e-5), "partial-block mismatch"

    # 4) Streamed per-layer fallback (used when the weight stack exceeds VMEM).
    out3 = jax.block_until_ready(mlp_forward(x, prepared_f32, force_streaming=True))
    assert jnp.allclose(out3, ref, atol=1e-5, rtol=1e-5), "streamed path mismatch"

    print("KERNEL_OK")
</pallas_src>

<mosaic_0001>
module attributes {stable_mosaic.version = 11 : i64} {
  func.func @_fused_mlp_kernel(%arg0: i32, %arg1: memref<16x128xbf16, #tpu.memory_space<vmem>>, %arg2: memref<128x128xbf16, #tpu.memory_space<vmem>>, %arg3: memref<1x128xf32, #tpu.memory_space<vmem>>, %arg4: memref<128x128xbf16, #tpu.memory_space<vmem>>, %arg5: memref<1x128xf32, #tpu.memory_space<vmem>>, %arg6: memref<128x128xbf16, #tpu.memory_space<vmem>>, %arg7: memref<1x128xf32, #tpu.memory_space<vmem>>, %arg8: memref<16x128xf32, #tpu.memory_space<vmem>>) attributes {dimension_semantics = [#tpu.dimension_semantics<parallel>], iteration_bounds = array<i64: 1>, scalar_prefetch = 0 : i64, scratch_operands = 0 : i64, tpu.core_type = #tpu.core_type<tc>, window_params = [{transform_indices = @transform_0, window_bounds = array<i64: 16, 128>}, {pipeline_mode = #tpu.pipeline_mode<synchronous>, transform_indices = @transform_1, window_bounds = array<i64: 128, 128>}, {pipeline_mode = #tpu.pipeline_mode<synchronous>, transform_indices = @transform_2, window_bounds = array<i64: 1, 128>}, {pipeline_mode = #tpu.pipeline_mode<synchronous>, transform_indices = @transform_3, window_bounds = array<i64: 128, 128>}, {pipeline_mode = #tpu.pipeline_mode<synchronous>, transform_indices = @transform_4, window_bounds = array<i64: 1, 128>}, {pipeline_mode = #tpu.pipeline_mode<synchronous>, transform_indices = @transform_5, window_bounds = array<i64: 128, 128>}, {pipeline_mode = #tpu.pipeline_mode<synchronous>, transform_indices = @transform_6, window_bounds = array<i64: 1, 128>}, {transform_indices = @transform_7, window_bounds = array<i64: 16, 128>}]} {
    %c0 = arith.constant 0 : index
    %c0_0 = arith.constant 0 : index
    %0 = vector.load %arg1[%c0, %c0_0] : memref<16x128xbf16, #tpu.memory_space<vmem>>, vector<16x128xbf16>
    %c0_1 = arith.constant 0 : index
    %c0_2 = arith.constant 0 : index
    %1 = vector.load %arg2[%c0_1, %c0_2] : memref<128x128xbf16, #tpu.memory_space<vmem>>, vector<128x128xbf16>
    %c0_3 = arith.constant 0 : index
    %c0_4 = arith.constant 0 : index
    %2 = vector.load %arg3[%c0_3, %c0_4] : memref<1x128xf32, #tpu.memory_space<vmem>>, vector<1x128xf32>
    %cst = arith.constant dense<0.000000e+00> : vector<16x128xf32>
    %3 = tpu.matmul %0, %1, %cst {dimension_numbers = #tpu.dot_dimension_numbers<[1], [0], [0], [1], [0, 0, 1, 1], [], []>} : vector<16x128xbf16>, vector<128x128xbf16>, vector<16x128xf32> -> vector<16x128xf32>
    %4 = vector.broadcast %2 : vector<1x128xf32> to vector<16x128xf32>
    %5 = arith.addf %3, %4 : vector<16x128xf32>
    %cst_5 = arith.constant 0.000000e+00 : f32
    %6 = vector.broadcast %cst_5 : f32 to vector<16x128xf32>
    %7 = arith.maximumf %5, %6 : vector<16x128xf32>
    %8 = arith.truncf %7 : vector<16x128xf32> to vector<16x128xbf16>
    %c0_6 = arith.constant 0 : index
    %c0_7 = arith.constant 0 : index
    %9 = vector.load %arg4[%c0_6, %c0_7] : memref<128x128xbf16, #tpu.memory_space<vmem>>, vector<128x128xbf16>
    %c0_8 = arith.constant 0 : index
    %c0_9 = arith.constant 0 : index
    %10 = vector.load %arg5[%c0_8, %c0_9] : memref<1x128xf32, #tpu.memory_space<vmem>>, vector<1x128xf32>
    %cst_10 = arith.constant dense<0.000000e+00> : vector<16x128xf32>
    %11 = tpu.matmul %8, %9, %cst_10 {dimension_numbers = #tpu.dot_dimension_numbers<[1], [0], [0], [1], [0, 0, 1, 1], [], []>} : vector<16x128xbf16>, vector<128x128xbf16>, vector<16x128xf32> -> vector<16x128xf32>
    %12 = vector.broadcast %10 : vector<1x128xf32> to vector<16x128xf32>
    %13 = arith.addf %11, %12 : vector<16x128xf32>
    %cst_11 = arith.constant 0.000000e+00 : f32
    %14 = vector.broadcast %cst_11 : f32 to vector<16x128xf32>
    %15 = arith.maximumf %13, %14 : vector<16x128xf32>
    %16 = arith.truncf %15 : vector<16x128xf32> to vector<16x128xbf16>
    %c0_12 = arith.constant 0 : index
    %c0_13 = arith.constant 0 : index
    %17 = vector.load %arg6[%c0_12, %c0_13] : memref<128x128xbf16, #tpu.memory_space<vmem>>, vector<128x128xbf16>
    %c0_14 = arith.constant 0 : index
    %c0_15 = arith.constant 0 : index
    %18 = vector.load %arg7[%c0_14, %c0_15] : memref<1x128xf32, #tpu.memory_space<vmem>>, vector<1x128xf32>
    %cst_16 = arith.constant dense<0.000000e+00> : vector<16x128xf32>
    %19 = tpu.matmul %16, %17, %cst_16 {dimension_numbers = #tpu.dot_dimension_numbers<[1], [0], [0], [1], [0, 0, 1, 1], [], []>} : vector<16x128xbf16>, vector<128x128xbf16>, vector<16x128xf32> -> vector<16x128xf32>
    %20 = vector.broadcast %18 : vector<1x128xf32> to vector<16x128xf32>
    %21 = arith.addf %19, %20 : vector<16x128xf32>
    %c0_17 = arith.constant 0 : index
    %c0_18 = arith.constant 0 : index
    %22 = vector.load %arg8[%c0_17, %c0_18] : memref<16x128xf32, #tpu.memory_space<vmem>>, vector<16x128xf32>
    tpu.vector_store %arg8[%c0_17, %c0_18], %21 {strides = array<i32>} : memref<16x128xf32, #tpu.memory_space<vmem>>, vector<16x128xf32>,
    return
  }
  func.func @transform_0(%arg0: i32) -> (i32, i32) {
    %c0_i32 = arith.constant 0 : i32
    %c0_i32_0 = arith.constant 0 : i32
    return %arg0, %c0_i32 : i32, i32
  }
  func.func @transform_1(%arg0: i32) -> (i32, i32) {
    %c0_i32 = arith.constant 0 : i32
    %c0_i32_0 = arith.constant 0 : i32
    %c0_i32_1 = arith.constant 0 : i32
    return %c0_i32, %c0_i32_0 : i32, i32
  }
  func.func @transform_2(%arg0: i32) -> (i32, i32) {
    %c0_i32 = arith.constant 0 : i32
    %c0_i32_0 = arith.constant 0 : i32
    %c0_i32_1 = arith.constant 0 : i32
    return %c0_i32, %c0_i32_0 : i32, i32
  }
  func.func @transform_3(%arg0: i32) -> (i32, i32) {
    %c0_i32 = arith.constant 0 : i32
    %c0_i32_0 = arith.constant 0 : i32
    %c0_i32_1 = arith.constant 0 : i32
    return %c0_i32, %c0_i32_0 : i32, i32
  }
  func.func @transform_4(%arg0: i32) -> (i32, i32) {
    %c0_i32 = arith.constant 0 : i32
    %c0_i32_0 = arith.constant 0 : i32
    %c0_i32_1 = arith.constant 0 : i32
    return %c0_i32, %c0_i32_0 : i32, i32
  }
  func.func @transform_5(%arg0: i32) -> (i32, i32) {
    %c0_i32 = arith.constant 0 : i32
    %c0_i32_0 = arith.constant 0 : i32
    %c0_i32_1 = arith.constant 0 : i32
    return %c0_i32, %c0_i32_0 : i32, i32
  }
  func.func @transform_6(%arg0: i32) -> (i32, i32) {
    %c0_i32 = arith.constant 0 : i32
    %c0_i32_0 = arith.constant 0 : i32
    %c0_i32_1 = arith.constant 0 : i32
    return %c0_i32, %c0_i32_0 : i32, i32
  }
  func.func @transform_7(%arg0: i32) -> (i32, i32) {
    %c0_i32 = arith.constant 0 : i32
    %c0_i32_0 = arith.constant 0 : i32
    return %arg0, %c0_i32 : i32, i32
  }
}

module attributes {stable_mosaic.version = 11 : i64} {
  func.func @_fused_mlp_kernel(%arg0: i32, %arg1: memref<16x128xbf16, #tpu.memory_space<vmem>>, %arg2: memref<128x128xbf16, #tpu.memory_space<vmem>>, %arg3: memref<1x128xf32, #tpu.memory_space<vmem>>, %arg4: memref<128x128xbf16, #tpu.memory_space<vmem>>, %arg5: memref<1x128xf32, #tpu.memory_space<vmem>>, %arg6: memref<128x128xbf16, #tpu.memory_space<vmem>>, %arg7: memref<1x128xf32, #tpu.memory_space<vmem>>, %arg8: memref<16x128xf32, #tpu.memory_space<vmem>>) attributes {dimension_semantics = [#tpu.dimension_semantics<parallel>], iteration_bounds = array<i64: 1>, scalar_prefetch = 0 : i64, scratch_operands = 0 : i64, tpu.core_type = #tpu.core_type<tc>, window_params = [{transform_indices = @transform_0, window_bounds = array<i64: 16, 128>}, {pipeline_mode = #tpu.pipeline_mode<synchronous>, transform_indices = @transform_1, window_bounds = array<i64: 128, 128>}, {pipeline_mode = #tpu.pipeline_mode<synchronous>, transform_indices = @transform_2, window_bounds = array<i64: 1, 128>}, {pipeline_mode = #tpu.pipeline_mode<synchronous>, transform_indices = @transform_3, window_bounds = array<i64: 128, 128>}, {pipeline_mode = #tpu.pipeline_mode<synchronous>, transform_indices = @transform_4, window_bounds = array<i64: 1, 128>}, {pipeline_mode = #tpu.pipeline_mode<synchronous>, transform_indices = @transform_5, window_bounds = array<i64: 128, 128>}, {pipeline_mode = #tpu.pipeline_mode<synchronous>, transform_indices = @transform_6, window_bounds = array<i64: 1, 128>}, {transform_indices = @transform_7, window_bounds = array<i64: 16, 128>}]} {
    %c0 = arith.constant 0 : index
    %c0_0 = arith.constant 0 : index
    %0 = vector.load %arg1[%c0, %c0_0] : memref<16x128xbf16, #tpu.memory_space<vmem>>, vector<16x128xbf16>
    %c0_1 = arith.constant 0 : index
    %c0_2 = arith.constant 0 : index
    %1 = vector.load %arg2[%c0_1, %c0_2] : memref<128x128xbf16, #tpu.memory_space<vmem>>, vector<128x128xbf16>
    %c0_3 = arith.constant 0 : index
    %c0_4 = arith.constant 0 : index
    %2 = vector.load %arg3[%c0_3, %c0_4] : memref<1x128xf32, #tpu.memory_space<vmem>>, vector<1x128xf32>
    %cst = arith.constant dense<0.000000e+00> : vector<16x128xf32>
    %3 = tpu.matmul %0, %1, %cst {dimension_numbers = #tpu.dot_dimension_numbers<[1], [0], [0], [1], [0, 0, 1, 1], [], []>} : vector<16x128xbf16>, vector<128x128xbf16>, vector<16x128xf32> -> vector<16x128xf32>
    %4 = vector.broadcast %2 : vector<1x128xf32> to vector<16x128xf32>
    %5 = arith.addf %3, %4 : vector<16x128xf32>
    %cst_5 = arith.constant 0.000000e+00 : f32
    %6 = vector.broadcast %cst_5 : f32 to vector<16x128xf32>
    %7 = arith.maximumf %5, %6 : vector<16x128xf32>
    %8 = arith.truncf %7 : vector<16x128xf32> to vector<16x128xbf16>
    %c0_6 = arith.constant 0 : index
    %c0_7 = arith.constant 0 : index
    %9 = vector.load %arg4[%c0_6, %c0_7] : memref<128x128xbf16, #tpu.memory_space<vmem>>, vector<128x128xbf16>
    %c0_8 = arith.constant 0 : index
    %c0_9 = arith.constant 0 : index
    %10 = vector.load %arg5[%c0_8, %c0_9] : memref<1x128xf32, #tpu.memory_space<vmem>>, vector<1x128xf32>
    %cst_10 = arith.constant dense<0.000000e+00> : vector<16x128xf32>
    %11 = tpu.matmul %8, %9, %cst_10 {dimension_numbers = #tpu.dot_dimension_numbers<[1], [0], [0], [1], [0, 0, 1, 1], [], []>} : vector<16x128xbf16>, vector<128x128xbf16>, vector<16x128xf32> -> vector<16x128xf32>
    %12 = vector.broadcast %10 : vector<1x128xf32> to vector<16x128xf32>
    %13 = arith.addf %11, %12 : vector<16x128xf32>
    %cst_11 = arith.constant 0.000000e+00 : f32
    %14 = vector.broadcast %cst_11 : f32 to vector<16x128xf32>
    %15 = arith.maximumf %13, %14 : vector<16x128xf32>
    %16 = arith.truncf %15 : vector<16x128xf32> to vector<16x128xbf16>
    %c0_12 = arith.constant 0 : index
    %c0_13 = arith.constant 0 : index
    %17 = vector.load %arg6[%c0_12, %c0_13] : memref<128x128xbf16, #tpu.memory_space<vmem>>, vector<128x128xbf16>
    %c0_14 = arith.constant 0 : index
    %c0_15 = arith.constant 0 : index
    %18 = vector.load %arg7[%c0_14, %c0_15] : memref<1x128xf32, #tpu.memory_space<vmem>>, vector<1x128xf32>
    %cst_16 = arith.constant dense<0.000000e+00> : vector<16x128xf32>
    %19 = tpu.matmul %16, %17, %cst_16 {dimension_numbers = #tpu.dot_dimension_numbers<[1], [0], [0], [1], [0, 0, 1, 1], [], []>} : vector<16x128xbf16>, vector<128x128xbf16>, vector<16x128xf32> -> vector<16x128xf32>
    %20 = vector.broadcast %18 : vector<1x128xf32> to vector<16x128xf32>
    %21 = arith.addf %19, %20 : vector<16x128xf32>
    %c0_17 = arith.constant 0 : index
    %c0_18 = arith.constant 0 : index
    %22 = vector.load %arg8[%c0_17, %c0_18] : memref<16x128xf32, #tpu.memory_space<vmem>>, vector<16x128xf32>
    tpu.vector_store %arg8[%c0_17, %c0_18], %21 {strides = array<i32>} : memref<16x128xf32, #tpu.memory_space<vmem>>, vector<16x128xf32>,
    return
  }
  func.func @transform_0(%arg0: i32) -> (i32, i32) {
    %c0_i32 = arith.constant 0 : i32
    %c0_i32_0 = arith.constant 0 : i32
    return %arg0, %c0_i32 : i32, i32
  }
  func.func @transform_1(%arg0: i32) -> (i32, i32) {
    %c0_i32 = arith.constant 0 : i32
    %c0_i32_0 = arith.constant 0 : i32
    %c0_i32_1 = arith.constant 0 : i32
    return %c0_i32, %c0_i32_0 : i32, i32
  }
  func.func @transform_2(%arg0: i32) -> (i32, i32) {
    %c0_i32 = arith.constant 0 : i32
    %c0_i32_0 = arith.constant 0 : i32
    %c0_i32_1 = arith.constant 0 : i32
    return %c0_i32, %c0_i32_0 : i32, i32
  }
  func.func @transform_3(%arg0: i32) -> (i32, i32) {
    %c0_i32 = arith.constant 0 : i32
    %c0_i32_0 = arith.constant 0 : i32
    %c0_i32_1 = arith.constant 0 : i32
    return %c0_i32, %c0_i32_0 : i32, i32
  }
  func.func @transform_4(%arg0: i32) -> (i32, i32) {
    %c0_i32 = arith.constant 0 : i32
    %c0_i32_0 = arith.constant 0 : i32
    %c0_i32_1 = arith.constant 0 : i32
    return %c0_i32, %c0_i32_0 : i32, i32
  }
  func.func @transform_5(%arg0: i32) -> (i32, i32) {
    %c0_i32 = arith.constant 0 : i32
    %c0_i32_0 = arith.constant 0 : i32
    %c0_i32_1 = arith.constant 0 : i32
    return %c0_i32, %c0_i32_0 : i32, i32
  }
  func.func @transform_6(%arg0: i32) -> (i32, i32) {
    %c0_i32 = arith.constant 0 : i32
    %c0_i32_0 = arith.constant 0 : i32
    %c0_i32_1 = arith.constant 0 : i32
    return %c0_i32, %c0_i32_0 : i32, i32
  }
  func.func @transform_7(%arg0: i32) -> (i32, i32) {
    %c0_i32 = arith.constant 0 : i32
    %c0_i32_0 = arith.constant 0 : i32
    return %arg0, %c0_i32 : i32, i32
  }
}

module attributes {stable_mosaic.version = 11 : i64} {
  func.func @_linear_kernel(%arg0: i32, %arg1: i32, %arg2: i32, %arg3: memref<16x128xbf16, #tpu.memory_space<vmem>>, %arg4: memref<128x128xbf16, #tpu.memory_space<vmem>>, %arg5: memref<1x128xf32, #tpu.memory_space<vmem>>, %arg6: memref<16x128xbf16, #tpu.memory_space<vmem>>, %arg7: memref<16x128xf32, #tpu.memory_space<vmem>>) attributes {dimension_semantics = [#tpu.dimension_semantics<parallel>, #tpu.dimension_semantics<parallel>, #tpu.dimension_semantics<arbitrary>], iteration_bounds = array<i64: 1, 1, 1>, scalar_prefetch = 0 : i64, scratch_operands = 1 : i64, tpu.core_type = #tpu.core_type<tc>, window_params = [{transform_indices = @transform_0, window_bounds = array<i64: 16, 128>}, {transform_indices = @transform_1, window_bounds = array<i64: 128, 128>}, {transform_indices = @transform_2, window_bounds = array<i64: 1, 128>}, {transform_indices = @transform_3, window_bounds = array<i64: 16, 128>}]} {
    %c0_i32 = arith.constant 0 : i32
    %0 = arith.cmpi eq, %arg2, %c0_i32 : i32
    %1 = arith.extui %0 : i1 to i32
    %c0_i32_0 = arith.constant 0 : i32
    %2 = arith.cmpi ne, %1, %c0_i32_0 : i32
    scf.if %2 {
      %cst_10 = arith.constant 0.000000e+00 : f32
      %12 = vector.broadcast %cst_10 : f32 to vector<16x128xf32>
      %c0_11 = arith.constant 0 : index
      %c0_12 = arith.constant 0 : index
      %13 = vector.load %arg7[%c0_11, %c0_12] : memref<16x128xf32, #tpu.memory_space<vmem>>, vector<16x128xf32>
      tpu.vector_store %arg7[%c0_11, %c0_12], %12 {strides = array<i32>} : memref<16x128xf32, #tpu.memory_space<vmem>>, vector<16x128xf32>,
    } else {
    }
    %c0 = arith.constant 0 : index
    %c0_1 = arith.constant 0 : index
    %3 = vector.load %arg7[%c0, %c0_1] : memref<16x128xf32, #tpu.memory_space<vmem>>, vector<16x128xf32>
    %c0_2 = arith.constant 0 : index
    %c0_3 = arith.constant 0 : index
    %4 = vector.load %arg3[%c0_2, %c0_3] : memref<16x128xbf16, #tpu.memory_space<vmem>>, vector<16x128xbf16>
    %c0_4 = arith.constant 0 : index
    %c0_5 = arith.constant 0 : index
    %5 = vector.load %arg4[%c0_4, %c0_5] : memref<128x128xbf16, #tpu.memory_space<vmem>>, vector<128x128xbf16>
    %cst = arith.constant dense<0.000000e+00> : vector<16x128xf32>
    %6 = tpu.matmul %4, %5, %cst {dimension_numbers = #tpu.dot_dimension_numbers<[1], [0], [0], [1], [0, 0, 1, 1], [], []>} : vector<16x128xbf16>, vector<128x128xbf16>, vector<16x128xf32> -> vector<16x128xf32>
    %7 = arith.addf %3, %6 : vector<16x128xf32>
    %c0_6 = arith.constant 0 : index
    %c0_7 = arith.constant 0 : index
    %8 = vector.load %arg7[%c0_6, %c0_7] : memref<16x128xf32, #tpu.memory_space<vmem>>, vector<16x128xf32>
    tpu.vector_store %arg7[%c0_6, %c0_7], %7 {strides = array<i32>} : memref<16x128xf32, #tpu.memory_space<vmem>>, vector<16x128xf32>,
    %c0_i32_8 = arith.constant 0 : i32
    %9 = arith.cmpi eq, %arg2, %c0_i32_8 : i32
    %10 = arith.extui %9 : i1 to i32
    %c0_i32_9 = arith.constant 0 : i32
    %11 = arith.cmpi ne, %10, %c0_i32_9 : i32
    scf.if %11 {
      %c0_10 = arith.constant 0 : index
      %c0_11 = arith.constant 0 : index
      %12 = vector.load %arg7[%c0_10, %c0_11] : memref<16x128xf32, #tpu.memory_space<vmem>>, vector<16x128xf32>
      %c0_12 = arith.constant 0 : index
      %c0_13 = arith.constant 0 : index
      %13 = vector.load %arg5[%c0_12, %c0_13] : memref<1x128xf32, #tpu.memory_space<vmem>>, vector<1x128xf32>
      %14 = vector.broadcast %13 : vector<1x128xf32> to vector<16x128xf32>
      %15 = arith.addf %12, %14 : vector<16x128xf32>
      %cst_14 = arith.constant 0.000000e+00 : f32
      %16 = vector.broadcast %cst_14 : f32 to vector<16x128xf32>
      %17 = arith.maximumf %15, %16 : vector<16x128xf32>
      %18 = arith.truncf %17 : vector<16x128xf32> to vector<16x128xbf16>
      %c0_15 = arith.constant 0 : index
      %c0_16 = arith.constant 0 : index
      %19 = vector.load %arg6[%c0_15, %c0_16] : memref<16x128xbf16, #tpu.memory_space<vmem>>, vector<16x128xbf16>
      tpu.vector_store %arg6[%c0_15, %c0_16], %18 {strides = array<i32>} : memref<16x128xbf16, #tpu.memory_space<vmem>>, vector<16x128xbf16>,
    } else {
    }
    return
  }
  func.func @transform_0(%arg0: i32, %arg1: i32, %arg2: i32) -> (i32, i32) {
    %c0_i32 = arith.constant 0 : i32
    return %arg0, %arg2 : i32, i32
  }
  func.func @transform_1(%arg0: i32, %arg1: i32, %arg2: i32) -> (i32, i32) {
    %c0_i32 = arith.constant 0 : i32
    return %arg2, %arg1 : i32, i32
  }
  func.func @transform_2(%arg0: i32, %arg1: i32, %arg2: i32) -> (i32, i32) {
    %c0_i32 = arith.constant 0 : i32
    %c0_i32_0 = arith.constant 0 : i32
    return %c0_i32, %arg1 : i32, i32
  }
  func.func @transform_3(%arg0: i32, %arg1: i32, %arg2: i32) -> (i32, i32) {
    %c0_i32 = arith.constant 0 : i32
    return %arg0, %arg1 : i32, i32
  }
}

</mosaic_0001>

<bundles_post_ra>
// kernel: tpu_custom_call.1
= control target key start
LH: loop header
LB: loop body
LE: loop exit
PB: predicated region body
PF: predicated region fallthrough
CT: control target
= control target key end

     0   :  { %12 = vsyncpa [#allocation3], 0  ;;  %s711_s0 = inlined_call_operand.hbm [shape: bf16[16,128], index: 0, kind: input, shape index: {}]   ;;  %s712_s1 = inlined_call_operand.hbm [shape: bf16[128,128], index: 1, kind: input, shape index: {}]   ;;  %s713_s2 = inlined_call_operand.vmem [shape: f32[1,128], index: 2, kind: input, shape index: {}]   ;;  %s714_s3 = inlined_call_operand.hbm [shape: bf16[128,128], index: 3, kind: input, shape index: {}]   ;;  %s715_s4 = inlined_call_operand.vmem [shape: f32[1,128], index: 4, kind: input, shape index: {}]   ;;  %s716_s5 = inlined_call_operand.hbm [shape: bf16[128,128], index: 5, kind: input, shape index: {}]   ;;  %s717_s6 = inlined_call_operand.vmem [shape: f32[1,128], index: 6, kind: input, shape index: {}]   ;;  %s718_s7 = inlined_call_operand.hbm [shape: f32[16,128], index: 7, kind: output, shape index: {}]  }
   0x1   :  { %13 = vsyncpa [#allocation6], 0 }
   0x2   :  { %14 = vsyncpa [#allocation9], 0 }
   0x3   :  { %15 = vsyncpa [#allocation4], 0  ;;  %s33_s26 = sshll.u32 %s712_s1, 4  ;;  %s638_s27 = smov [#allocation5]   ;;  %s34_s26 = int_to_ptr.hbm [resolvable:$true] %s33_s26 }
   0x4   :  { %s35_s28 = sshll.u32 %s638_s27, 4  ;;  %s20_s8 = sshll.u32 %s711_s0, 4  ;;  %s36_s28 = int_to_ptr.vmem [resolvable:$true] %s35_s28  ;;  %s21_s8 = int_to_ptr.hbm [resolvable:$true] %s20_s8 }
   0x5   :  { %s639_s9 = smov 64   ;;  %s640_s10 = smov 4  }
   0x6   :  { %41 = dma.hbm_to_vmem [thread:$0]  %s34_s26, 1024, %s36_s28, [#allocation6], %s639_s9, %s639_s9, %s640_s10  }
   0x7   :  { %s641_s11 = smov [#allocation2]   ;;  %s48_s15 = sshll.u32 %s714_s3, 4  ;;  %s49_s15 = int_to_ptr.hbm [resolvable:$true] %s48_s15 }
   0x8   :  { %s22_s12 = sshll.u32 %s641_s11, 4  ;;  %s63_s17 = sshll.u32 %s716_s5, 4  ;;  %s23_s12 = int_to_ptr.vmem [resolvable:$true] %s22_s12  ;;  %s64_s17 = int_to_ptr.hbm [resolvable:$true] %s63_s17 }
   0x9   :  { %28 = dma.hbm_to_vmem [thread:$0]  %s21_s8, 128, %s23_s12, [#allocation3], %s639_s9, %s639_s9, %s640_s10  }
   0xa   :  { %s642_s18 = smov [#allocation7]   ;;  %s643_s0 = smov [#allocation8]  }
   0xb   :  { %s50_s19 = sshll.u32 %s642_s18, 4  ;;  %s65_s20 = sshll.u32 %s643_s0, 4  ;;  %s51_s19 = int_to_ptr.vmem [resolvable:$true] %s50_s19  ;;  %s66_s20 = int_to_ptr.vmem [resolvable:$true] %s65_s20 }
   0xc   :  { %56 = dma.hbm_to_vmem [thread:$0]  %s49_s15, 1024, %s51_s19, [#allocation6], %s639_s9, %s639_s9, %s640_s10  }
   0xd   :  { %71 = dma.hbm_to_vmem [thread:$0]  %s64_s17, 1024, %s66_s20, [#allocation9], %s639_s9, %s639_s9, %s640_s10  }
   0xe   :  { %630 = dma.done.wait [#allocation3], 128  }
   0xf   :  { %631 = vsyncadd [#allocation3], 4294967168 }
  0x10   :  { %632 = dma.done.wait [#allocation6], 2048  }
  0x11   :  { %633 = vsyncadd [#allocation6], 4294965248 }
  0x12   :  { %634 = dma.done.wait [#allocation9], 1024  }
  0x13   :  { %635 = vsyncadd [#allocation9], 4294966272  ;;  %v481_v0 = vld [vmem:[#allocation5 + $0x38] sm:$0xff]  ;;  %v480_v1 = vld [vmem:[#allocation5 + $0x30] sm:$0xff]  ;;  %s644_s24 = smov [#allocation10]   ;;  %s645_s28 = smov 128  }
  0x14   :  { %166 = vmatpush.bf16.msra.mxu0 %v481_v0  ;;  %v489_v2 = vld [vmem:[#allocation7 + $0x38] sm:$0xff]  ;;  %v488_v3 = vld [vmem:[#allocation7 + $0x30] sm:$0xff]  ;;  %v479_v4 = vld [vmem:[#allocation5 + $0x28] sm:$0xff]  ;;  %s356_s25 = sshll.u32 %s644_s24, 4  ;;  %s646_s29 = smov 8   ;;  %s357_s25 = int_to_ptr.vmem [resolvable:$true] %s356_s25 }
  0x15   :  { %251 = vmatpush.bf16.msra.mxu1 %v489_v2  ;;  %v487_v5 = vld [vmem:[#allocation7 + $0x28] sm:$0xff]  ;;  %v478_v6 = vld [vmem:[#allocation5 + $0x20] sm:$0xff]  ;;  %v477_v8 = vld [vmem:[#allocation5 + $0x18] sm:$0xff] }
  0x16   :  { %v486_v7 = vld [vmem:[#allocation7 + $0x20] sm:$0xff]  ;;  %v476_v9 = vld [vmem:[#allocation5 + $0x10] sm:$0xff]  ;;  %v475_v10 = vld [vmem:[#allocation5 + $0x8] sm:$0xff] }
  0x17   :  { %v474_v11 = vld [vmem:[#allocation5] sm:$0xff]  ;;  %v473_v12 = vld [vmem:[#allocation2] sm:$0xff]  ;;  %v484_v14 = vld [vmem:[#allocation7 + $0x10] sm:$0xff] }
  0x18   :  { %167 = vmatpush.bf16.msra.mxu0 %v480_v1  ;;  %v485_v13 = vld [vmem:[#allocation7 + $0x18] sm:$0xff]  ;;  %v483_v15 = vld [vmem:[#allocation7 + $0x8] sm:$0xff]  ;;  %v482_v16 = vld [vmem:[#allocation7] sm:$0xff] }
  0x19   :  { %252 = vmatpush.bf16.msra.mxu1 %v488_v3  ;;  %v497_v17 = vld [vmem:[#allocation8 + $0x38] sm:$0xff]  ;;  %v496_v18 = vld [vmem:[#allocation8 + $0x30] sm:$0xff]  ;;  %v495_v19 = vld [vmem:[#allocation8 + $0x28] sm:$0xff] }
  0x1a   :  { %336 = vmatpush.bf16.msra.mxu2 %v497_v17  ;;  %v494_v20 = vld [vmem:[#allocation8 + $0x20] sm:$0xff]  ;;  %v507_v22 = vld [vmem:[%s713_s2] ss:$0 sm:$0xff]  ;;  %v492_v30 = vld [vmem:[#allocation8 + $0x10] sm:$0xff] }
  0x1b   :  { %v493_v29 = vld [vmem:[#allocation8 + $0x18] sm:$0xff]  ;;  %v491_v31 = vld [vmem:[#allocation8 + $0x8] sm:$0xff]  ;;  %v490_v32 = vld [vmem:[#allocation8] sm:$0xff] }
  0x1c   :  { %168 = vmatpush.bf16.msra.mxu0 %v479_v4  ;;  %v508_v34 = vld [vmem:[%s715_s4] ss:$0 sm:$0xff]  ;;  %s358_s4 = sshll.u32 %s718_s7, 4  ;;  %s359_s4 = int_to_ptr.hbm [resolvable:$true] %s358_s4 }
  0x1d   :  { %253 = vmatpush.bf16.msra.mxu1 %v487_v5  ;;  %v509_v41 = vld [vmem:[%s717_s6] ss:$0 sm:$0xff] }
  0x1e   :  { %337 = vmatpush.bf16.msra.mxu2 %v496_v18 }
  0x20   :  { %169 = vmatpush.bf16.msra.mxu0 %v478_v6 }
  0x21   :  { %254 = vmatpush.bf16.msra.mxu1 %v486_v7 }
  0x22   :  { %338 = vmatpush.bf16.msra.mxu2 %v495_v19 }
  0x24   :  { %170 = vmatpush.bf16.msra.mxu0 %v477_v8 }
  0x25   :  { %255 = vmatpush.bf16.msra.mxu1 %v485_v13 }
  0x26   :  { %339 = vmatpush.bf16.msra.mxu2 %v494_v20 }
  0x28   :  { %171 = vmatpush.bf16.msra.mxu0 %v476_v9 }
  0x29   :  { %256 = vmatpush.bf16.msra.mxu1 %v484_v14 }
  0x2a   :  { %340 = vmatpush.bf16.msra.mxu2 %v493_v29 }
  0x2c   :  { %172 = vmatpush.bf16.msra.mxu0 %v475_v10 }
  0x2d   :  { %257 = vmatpush.bf16.msra.mxu1 %v483_v15 }
  0x2e   :  { %341 = vmatpush.bf16.msra.mxu2 %v492_v30 }
  0x30   :  { %173 = vmatpush.bf16.msra.mxu0 %v474_v11 }
  0x31   :  { %258 = vmatpush.bf16.msra.mxu1 %v482_v16 }
  0x32   :  { %342 = vmatpush.bf16.msra.mxu2 %v491_v31 }
  0x33   :  { %174 = vmatmul.bf16.vlgmr.msra.gmra.mxu0 %v473_v12 }
  0x36   :  { %343 = vmatpush.bf16.msra.mxu2 %v490_v32 }
  0xb0   :  { %v175_v21 = vpop.f32.mrf.mxu0 }
  0xb1   :  { %v176_v23 = vadd.f32 %v507_v22, %v175_v21 }
  0xb3   :  { %v180_v26 = vmax.f32 %v176_v23, 0.0 }
  0xb8   :  { %v177_v24 = vpop.f32.mrf.mxu0 }
  0xb9   :  { %v178_v25 = vadd.f32 %v507_v22, %v177_v24 }
  0xbb   :  { %v181_v27 = vmax.f32 %v178_v25, 0.0 }
  0xbd   :  { %v182_v28 = vpack.c.bf16 %v181_v27, %v180_v26 }
  0xbf   :  { %259 = vmatmul.bf16.vlgmr.msra.gmra.mxu1 %v182_v28 }
 0x13c   :  { %v260_v33 = vpop.f32.mrf.mxu1 }
 0x13d   :  { %v261_v35 = vadd.f32 %v508_v34, %v260_v33 }
 0x13f   :  { %v265_v38 = vmax.f32 %v261_v35, 0.0 }
 0x144   :  { %v262_v36 = vpop.f32.mrf.mxu1 }
 0x145   :  { %v263_v37 = vadd.f32 %v508_v34, %v262_v36 }
 0x147   :  { %v266_v39 = vmax.f32 %v263_v37, 0.0 }
 0x149   :  { %v267_v40 = vpack.c.bf16 %v266_v39, %v265_v38 }
 0x14b   :  { %344 = vmatmul.bf16.vlgmr.msra.gmra.mxu2 %v267_v40 }
 0x1ce   :  { %v345_v42 = vpop.f32.mrf.mxu2 }
 0x1cf   :  { %v346_v43 = vadd.f32 %v509_v41, %v345_v42 }
 0x1d1   :  { %350 = vst [vmem:[#allocation10] sm:$0xff] %v346_v43 }
 0x1d6   :  { %v347_v44 = vpop.f32.mrf.mxu2 }
 0x1d7   :  { %v348_v45 = vadd.f32 %v509_v41, %v347_v44 }
 0x1d9   :  { %351 = vst [vmem:[#allocation10 + $0x8] sm:$0xff] %v348_v45 }
 0x1da   :  { %364 = dma.vmem_to_hbm [thread:$0]  %s357_s25, 256, %s359_s4, [#allocation4], %s645_s28, %s645_s28, %s646_s29  }
 0x1db   :  { %636 = dma.done.wait [#allocation4], 256  }
 0x1dc   :  { %637 = vsyncadd [#allocation4], 4294967040 }
 0x1dd   :  { %369 = vsyncpa [#allocation3], 1 }
 0x1de   :  { %370 = vsyncpa [#allocation6], 1 }
 0x1df   :  { %371 = vsyncpa [#allocation9], 1 }
 0x1e0   :  { %372 = vsyncpa [#allocation4], 1 }

// kernel: tpu_custom_call.1
= control target key start
LH: loop header
LB: loop body
LE: loop exit
PB: predicated region body
PF: predicated region fallthrough
CT: control target
= control target key end

     0   :  { %12 = vsyncpa [#allocation3], 0  ;;  %s711_s0 = inlined_call_operand.hbm [shape: bf16[16,128], index: 0, kind: input, shape index: {}]   ;;  %s712_s1 = inlined_call_operand.hbm [shape: bf16[128,128], index: 1, kind: input, shape index: {}]   ;;  %s713_s2 = inlined_call_operand.vmem [shape: f32[1,128], index: 2, kind: input, shape index: {}]   ;;  %s714_s3 = inlined_call_operand.hbm [shape: bf16[128,128], index: 3, kind: input, shape index: {}]   ;;  %s715_s4 = inlined_call_operand.vmem [shape: f32[1,128], index: 4, kind: input, shape index: {}]   ;;  %s716_s5 = inlined_call_operand.hbm [shape: bf16[128,128], index: 5, kind: input, shape index: {}]   ;;  %s717_s6 = inlined_call_operand.vmem [shape: f32[1,128], index: 6, kind: input, shape index: {}]   ;;  %s718_s7 = inlined_call_operand.hbm [shape: f32[16,128], index: 7, kind: output, shape index: {}]  }
   0x1   :  { %13 = vsyncpa [#allocation6], 0 }
   0x2   :  { %14 = vsyncpa [#allocation9], 0 }
   0x3   :  { %15 = vsyncpa [#allocation4], 0  ;;  %s33_s26 = sshll.u32 %s712_s1, 4  ;;  %s638_s27 = smov [#allocation5]   ;;  %s34_s26 = int_to_ptr.hbm [resolvable:$true] %s33_s26 }
   0x4   :  { %s35_s28 = sshll.u32 %s638_s27, 4  ;;  %s20_s8 = sshll.u32 %s711_s0, 4  ;;  %s36_s28 = int_to_ptr.vmem [resolvable:$true] %s35_s28  ;;  %s21_s8 = int_to_ptr.hbm [resolvable:$true] %s20_s8 }
   0x5   :  { %s639_s9 = smov 64   ;;  %s640_s10 = smov 4  }
   0x6   :  { %41 = dma.hbm_to_vmem [thread:$0]  %s34_s26, 1024, %s36_s28, [#allocation6], %s639_s9, %s639_s9, %s640_s10  }
   0x7   :  { %s641_s11 = smov [#allocation2]   ;;  %s48_s15 = sshll.u32 %s714_s3, 4  ;;  %s49_s15 = int_to_ptr.hbm [resolvable:$true] %s48_s15 }
   0x8   :  { %s22_s12 = sshll.u32 %s641_s11, 4  ;;  %s63_s17 = sshll.u32 %s716_s5, 4  ;;  %s23_s12 = int_to_ptr.vmem [resolvable:$true] %s22_s12  ;;  %s64_s17 = int_to_ptr.hbm [resolvable:$true] %s63_s17 }
   0x9   :  { %28 = dma.hbm_to_vmem [thread:$0]  %s21_s8, 128, %s23_s12, [#allocation3], %s639_s9, %s639_s9, %s640_s10  }
   0xa   :  { %s642_s18 = smov [#allocation7]   ;;  %s643_s0 = smov [#allocation8]  }
   0xb   :  { %s50_s19 = sshll.u32 %s642_s18, 4  ;;  %s65_s20 = sshll.u32 %s643_s0, 4  ;;  %s51_s19 = int_to_ptr.vmem [resolvable:$true] %s50_s19  ;;  %s66_s20 = int_to_ptr.vmem [resolvable:$true] %s65_s20 }
   0xc   :  { %56 = dma.hbm_to_vmem [thread:$0]  %s49_s15, 1024, %s51_s19, [#allocation6], %s639_s9, %s639_s9, %s640_s10  }
   0xd   :  { %71 = dma.hbm_to_vmem [thread:$0]  %s64_s17, 1024, %s66_s20, [#allocation9], %s639_s9, %s639_s9, %s640_s10  }
   0xe   :  { %630 = dma.done.wait [#allocation3], 128  }
   0xf   :  { %631 = vsyncadd [#allocation3], 4294967168 }
  0x10   :  { %632 = dma.done.wait [#allocation6], 2048  }
  0x11   :  { %633 = vsyncadd [#allocation6], 4294965248 }
  0x12   :  { %634 = dma.done.wait [#allocation9], 1024  }
  0x13   :  { %635 = vsyncadd [#allocation9], 4294966272  ;;  %v481_v0 = vld [vmem:[#allocation5 + $0x38] sm:$0xff]  ;;  %v480_v1 = vld [vmem:[#allocation5 + $0x30] sm:$0xff]  ;;  %s644_s24 = smov [#allocation10]   ;;  %s645_s28 = smov 128  }
  0x14   :  { %166 = vmatpush.bf16.msra.mxu0 %v481_v0  ;;  %v489_v2 = vld [vmem:[#allocation7 + $0x38] sm:$0xff]  ;;  %v488_v3 = vld [vmem:[#allocation7 + $0x30] sm:$0xff]  ;;  %v479_v4 = vld [vmem:[#allocation5 + $0x28] sm:$0xff]  ;;  %s356_s25 = sshll.u32 %s644_s24, 4  ;;  %s646_s29 = smov 8   ;;  %s357_s25 = int_to_ptr.vmem [resolvable:$true] %s356_s25 }
  0x15   :  { %251 = vmatpush.bf16.msra.mxu1 %v489_v2  ;;  %v487_v5 = vld [vmem:[#allocation7 + $0x28] sm:$0xff]  ;;  %v478_v6 = vld [vmem:[#allocation5 + $0x20] sm:$0xff]  ;;  %v477_v8 = vld [vmem:[#allocation5 + $0x18] sm:$0xff] }
  0x16   :  { %v486_v7 = vld [vmem:[#allocation7 + $0x20] sm:$0xff]  ;;  %v476_v9 = vld [vmem:[#allocation5 + $0x10] sm:$0xff]  ;;  %v475_v10 = vld [vmem:[#allocation5 + $0x8] sm:$0xff] }
  0x17   :  { %v474_v11 = vld [vmem:[#allocation5] sm:$0xff]  ;;  %v473_v12 = vld [vmem:[#allocation2] sm:$0xff]  ;;  %v484_v14 = vld [vmem:[#allocation7 + $0x10] sm:$0xff] }
  0x18   :  { %167 = vmatpush.bf16.msra.mxu0 %v480_v1  ;;  %v485_v13 = vld [vmem:[#allocation7 + $0x18] sm:$0xff]  ;;  %v483_v15 = vld [vmem:[#allocation7 + $0x8] sm:$0xff]  ;;  %v482_v16 = vld [vmem:[#allocation7] sm:$0xff] }
  0x19   :  { %252 = vmatpush.bf16.msra.mxu1 %v488_v3  ;;  %v497_v17 = vld [vmem:[#allocation8 + $0x38] sm:$0xff]  ;;  %v496_v18 = vld [vmem:[#allocation8 + $0x30] sm:$0xff]  ;;  %v495_v19 = vld [vmem:[#allocation8 + $0x28] sm:$0xff] }
  0x1a   :  { %336 = vmatpush.bf16.msra.mxu2 %v497_v17  ;;  %v494_v20 = vld [vmem:[#allocation8 + $0x20] sm:$0xff]  ;;  %v507_v22 = vld [vmem:[%s713_s2] ss:$0 sm:$0xff]  ;;  %v492_v30 = vld [vmem:[#allocation8 + $0x10] sm:$0xff] }
  0x1b   :  { %v493_v29 = vld [vmem:[#allocation8 + $0x18] sm:$0xff]  ;;  %v491_v31 = vld [vmem:[#allocation8 + $0x8] sm:$0xff]  ;;  %v490_v32 = vld [vmem:[#allocation8] sm:$0xff] }
  0x1c   :  { %168 = vmatpush.bf16.msra.mxu0 %v479_v4  ;;  %v508_v34 = vld [vmem:[%s715_s4] ss:$0 sm:$0xff]  ;;  %s358_s4 = sshll.u32 %s718_s7, 4  ;;  %s359_s4 = int_to_ptr.hbm [resolvable:$true] %s358_s4 }
  0x1d   :  { %253 = vmatpush.bf16.msra.mxu1 %v487_v5  ;;  %v509_v41 = vld [vmem:[%s717_s6] ss:$0 sm:$0xff] }
  0x1e   :  { %337 = vmatpush.bf16.msra.mxu2 %v496_v18 }
  0x20   :  { %169 = vmatpush.bf16.msra.mxu0 %v478_v6 }
  0x21   :  { %254 = vmatpush.bf16.msra.mxu1 %v486_v7 }
  0x22   :  { %338 = vmatpush.bf16.msra.mxu2 %v495_v19 }
  0x24   :  { %170 = vmatpush.bf16.msra.mxu0 %v477_v8 }
  0x25   :  { %255 = vmatpush.bf16.msra.mxu1 %v485_v13 }
  0x26   :  { %339 = vmatpush.bf16.msra.mxu2 %v494_v20 }
  0x28   :  { %171 = vmatpush.bf16.msra.mxu0 %v476_v9 }
  0x29   :  { %256 = vmatpush.bf16.msra.mxu1 %v484_v14 }
  0x2a   :  { %340 = vmatpush.bf16.msra.mxu2 %v493_v29 }
  0x2c   :  { %172 = vmatpush.bf16.msra.mxu0 %v475_v10 }
  0x2d   :  { %257 = vmatpush.bf16.msra.mxu1 %v483_v15 }
  0x2e   :  { %341 = vmatpush.bf16.msra.mxu2 %v492_v30 }
  0x30   :  { %173 = vmatpush.bf16.msra.mxu0 %v474_v11 }
  0x31   :  { %258 = vmatpush.bf16.msra.mxu1 %v482_v16 }
  0x32   :  { %342 = vmatpush.bf16.msra.mxu2 %v491_v31 }
  0x33   :  { %174 = vmatmul.bf16.vlgmr.msra.gmra.mxu0 %v473_v12 }
  0x36   :  { %343 = vmatpush.bf16.msra.mxu2 %v490_v32 }
  0xb0   :  { %v175_v21 = vpop.f32.mrf.mxu0 }
  0xb1   :  { %v176_v23 = vadd.f32 %v507_v22, %v175_v21 }
  0xb3   :  { %v180_v26 = vmax.f32 %v176_v23, 0.0 }
  0xb8   :  { %v177_v24 = vpop.f32.mrf.mxu0 }
  0xb9   :  { %v178_v25 = vadd.f32 %v507_v22, %v177_v24 }
  0xbb   :  { %v181_v27 = vmax.f32 %v178_v25, 0.0 }
  0xbd   :  { %v182_v28 = vpack.c.bf16 %v181_v27, %v180_v26 }
  0xbf   :  { %259 = vmatmul.bf16.vlgmr.msra.gmra.mxu1 %v182_v28 }
 0x13c   :  { %v260_v33 = vpop.f32.mrf.mxu1 }
 0x13d   :  { %v261_v35 = vadd.f32 %v508_v34, %v260_v33 }
 0x13f   :  { %v265_v38 = vmax.f32 %v261_v35, 0.0 }
 0x144   :  { %v262_v36 = vpop.f32.mrf.mxu1 }
 0x145   :  { %v263_v37 = vadd.f32 %v508_v34, %v262_v36 }
 0x147   :  { %v266_v39 = vmax.f32 %v263_v37, 0.0 }
 0x149   :  { %v267_v40 = vpack.c.bf16 %v266_v39, %v265_v38 }
 0x14b   :  { %344 = vmatmul.bf16.vlgmr.msra.gmra.mxu2 %v267_v40 }
 0x1ce   :  { %v345_v42 = vpop.f32.mrf.mxu2 }
 0x1cf   :  { %v346_v43 = vadd.f32 %v509_v41, %v345_v42 }
 0x1d1   :  { %350 = vst [vmem:[#allocation10] sm:$0xff] %v346_v43 }
 0x1d6   :  { %v347_v44 = vpop.f32.mrf.mxu2 }
 0x1d7   :  { %v348_v45 = vadd.f32 %v509_v41, %v347_v44 }
 0x1d9   :  { %351 = vst [vmem:[#allocation10 + $0x8] sm:$0xff] %v348_v45 }
 0x1da   :  { %364 = dma.vmem_to_hbm [thread:$0]  %s357_s25, 256, %s359_s4, [#allocation4], %s645_s28, %s645_s28, %s646_s29  }
 0x1db   :  { %636 = dma.done.wait [#allocation4], 256  }
 0x1dc   :  { %637 = vsyncadd [#allocation4], 4294967040 }
 0x1dd   :  { %369 = vsyncpa [#allocation3], 1 }
 0x1de   :  { %370 = vsyncpa [#allocation6], 1 }
 0x1df   :  { %371 = vsyncpa [#allocation9], 1 }
 0x1e0   :  { %372 = vsyncpa [#allocation4], 1 }

// kernel: tpu_custom_call.1
= control target key start
LH: loop header
LB: loop body
LE: loop exit
PB: predicated region body
PF: predicated region fallthrough
CT: control target
= control target key end

     0   :  { %8 = vsyncpa [#allocation4], 0  ;;  %s362_s0 = inlined_call_operand.hbm [shape: bf16[16,128], index: 0, kind: input, shape index: {}]   ;;  %s363_s1 = inlined_call_operand.hbm [shape: bf16[128,128], index: 1, kind: input, shape index: {}]   ;;  %s364_s2 = inlined_call_operand.vmem [shape: f32[1,128], index: 2, kind: input, shape index: {}]   ;;  %s365_s3 = inlined_call_operand.hbm [shape: bf16[16,128], index: 3, kind: output, shape index: {}]  }
   0x1   :  { %9 = vsyncpa [#allocation7], 0 }
   0x2   :  { %10 = vsyncpa [#allocation5], 0  ;;  %s15_s14 = sshll.u32 %s362_s0, 4  ;;  %s316_s15 = smov [#allocation3]   ;;  %s16_s14 = int_to_ptr.hbm [resolvable:$true] %s15_s14 }
   0x3   :  { %s17_s16 = sshll.u32 %s316_s15, 4  ;;  %s28_s19 = sshll.u32 %s363_s1, 4  ;;  %s18_s16 = int_to_ptr.vmem [resolvable:$true] %s17_s16  ;;  %s29_s19 = int_to_ptr.hbm [resolvable:$true] %s28_s19 }
   0x4   :  { %s317_s20 = smov 64   ;;  %s318_s21 = smov 4  }
   0x5   :  { %23 = dma.hbm_to_vmem [thread:$0]  %s16_s14, 128, %s18_s16, [#allocation4], %s317_s20, %s317_s20, %s318_s21  }
   0x6   :  { %s319_s22 = smov [#allocation6]  }
   0x7   :  { %s30_s23 = sshll.u32 %s319_s22, 4  ;;  %s31_s23 = int_to_ptr.vmem [resolvable:$true] %s30_s23 }
   0x8   :  { %36 = dma.hbm_to_vmem [thread:$0]  %s29_s19, 1024, %s31_s23, [#allocation7], %s317_s20, %s317_s20, %s318_s21  }
   0x9   :  { %310 = dma.done.wait [#allocation4], 128  }
   0xa   :  { %311 = vsyncadd [#allocation4], 4294967168 }
   0xb   :  { %312 = dma.done.wait [#allocation7], 1024  }
   0xc   :  { %313 = vsyncadd [#allocation7], 4294966272  ;;  %v226_v0 = vld [vmem:[#allocation6 + $0x38] sm:$0xff]  ;;  %v225_v1 = vld [vmem:[#allocation6 + $0x30] sm:$0xff]  ;;  %s320_s24 = smov [#allocation8]   ;;  %s168_s28 = sshll.u32 %s365_s3, 4  ;;  %s169_s28 = int_to_ptr.hbm [resolvable:$true] %s168_s28 }
   0xd   :  { %127 = vmatpush.bf16.msra.mxu0 %v226_v0  ;;  %v224_v2 = vld [vmem:[#allocation6 + $0x28] sm:$0xff]  ;;  %v223_v3 = vld [vmem:[#allocation6 + $0x20] sm:$0xff]  ;;  %v222_v4 = vld [vmem:[#allocation6 + $0x18] sm:$0xff]  ;;  %s166_s25 = sshll.u32 %s320_s24, 4  ;;  %s167_s25 = int_to_ptr.vmem [resolvable:$true] %s166_s25 }
   0xe   :  { %v221_v5 = vld [vmem:[#allocation6 + $0x10] sm:$0xff]  ;;  %v220_v6 = vld [vmem:[#allocation6 + $0x8] sm:$0xff]  ;;  %v219_v7 = vld [vmem:[#allocation6] sm:$0xff] }
   0xf   :  { %v218_v8 = vld [vmem:[#allocation3] sm:$0xff] }
  0x10   :  { %v237_v10 = vld [vmem:[%s364_s2] ss:$0 sm:$0xff] }
  0x11   :  { %128 = vmatpush.bf16.msra.mxu0 %v225_v1 }
  0x15   :  { %129 = vmatpush.bf16.msra.mxu0 %v224_v2 }
  0x19   :  { %130 = vmatpush.bf16.msra.mxu0 %v223_v3 }
  0x1d   :  { %131 = vmatpush.bf16.msra.mxu0 %v222_v4 }
  0x21   :  { %132 = vmatpush.bf16.msra.mxu0 %v221_v5 }
  0x25   :  { %133 = vmatpush.bf16.msra.mxu0 %v220_v6 }
  0x29   :  { %134 = vmatpush.bf16.msra.mxu0 %v219_v7 }
  0x2c   :  { %135 = vmatmul.bf16.vlgmr.msra.gmra.mxu0 %v218_v8 }
  0xa9   :  { %v136_v9 = vpop.f32.mrf.mxu0 }
  0xaa   :  { %v154_v11 = vadd.f32 %v237_v10, %v136_v9 }
  0xac   :  { %v156_v14 = vmax.f32 %v154_v11, 0.0 }
  0xb1   :  { %v138_v12 = vpop.f32.mrf.mxu0 }
  0xb2   :  { %v155_v13 = vadd.f32 %v237_v10, %v138_v12 }
  0xb4   :  { %v157_v15 = vmax.f32 %v155_v13, 0.0 }
  0xb6   :  { %v230_v16 = vpack.c.bf16 %v157_v15, %v156_v14 }
  0xb8   :  { %231 = vst [vmem:[#allocation8] sm:$0xff] %v230_v16  }
  0xb9   :  { %174 = dma.vmem_to_hbm [thread:$0]  %s167_s25, 128, %s169_s28, [#allocation5], %s317_s20, %s317_s20, %s318_s21  }
  0xba   :  { %314 = dma.done.wait [#allocation5], 128  }
  0xbb   :  { %315 = vsyncadd [#allocation5], 4294967168 }
  0xbc   :  { %179 = vsyncpa [#allocation4], 1 }
  0xbd   :  { %180 = vsyncpa [#allocation7], 1 }
  0xbe   :  { %181 = vsyncpa [#allocation5], 1 }

</bundles_post_ra>
